<compile_context>
chip_gen: v7x
topology: tpu7x:2x2x1
jax: 0.10.0
libtpu: 0.0.40
codegen_flags: <defaults>
</compile_context>

<pallas_src>
import jax
import jax.numpy as jnp
from jax import lax
from jax.experimental import pallas as pl
from jax.experimental.pallas import tpu as pltpu

# --- model config (small, consistent with the module's forward) ---
VOCAB_SIZE = 50
EMBED_DIM = 32
NUM_FILTERS = 8
FILTER_SIZES = (3, 4, 5)
OUTPUT_DIM = 4
PADDING_IDX = 0
BATCH = 2
SEQ_LEN = 16

MAX_FS = max(FILTER_SIZES)
BL = BATCH * SEQ_LEN
BL_PAD = BL + MAX_FS - 1                    # pad ids so tap-k shifts stay in bounds
NF_TOTAL = len(FILTER_SIZES) * NUM_FILTERS  # 24

K_FOLD = MAX_FS * VOCAB_SIZE                # 250 real one-hot im2col columns
BIAS_COL = K_FOLD                           # homogeneous ones column -> conv bias
K_PAD = ((K_FOLD + 1 + 127) // 128) * 128   # 256: sublane/MXU aligned K

# parameter-slab row layout (all block starts are multiples of 8)
ROW_FCW = K_PAD                             # fc weight rows [256, 280)
ROW_AUX = K_PAD + NF_TOTAL                  # aux rows       [280, 288)
PARAM_ROWS = ROW_AUX + 8                    # 288


def cnn_kernel(ids_ref, params_ref, out_ref):
    ids = ids_ref[...]                                              # (BL_PAD, 1) int32

    # ---- fused one-hot im2col: column (k*V + v) is 1 iff ids[t+k] == v; column
    #      BIAS_COL is always 1 (homogeneous coordinate for the conv bias). Pure VPU.
    col = lax.broadcasted_iota(jnp.int32, (BL, K_PAD), 1)
    onehot = (col == BIAS_COL).astype(jnp.float32)                  # ones column (bias)
    for k in range(MAX_FS):
        ids_k = ids[k:k + BL, :] + k * VOCAB_SIZE                   # (BL, 1) int32, cheap shift
        onehot = onehot + (col == ids_k).astype(jnp.float32)

    # ---- ONE matmul = embedding gather + all conv widths + conv bias --------------
    w_fold = params_ref[0:K_PAD, :]                                 # (256, NF_TOTAL)
    h = jnp.dot(onehot, w_fold, preferred_element_type=jnp.float32)  # (BL, NF_TOTAL)
    h = jnp.maximum(h, 0.0)                                         # ReLU

    # rows with pos > L - fs are im2col garbage for that width; zero them.
    # Valid ONLY because ReLU output >= 0, so extra zeros never change the max.
    aux = params_ref[ROW_AUX:ROW_AUX + 8, :]                        # (8, NF_TOTAL)
    pos = lax.rem(lax.broadcasted_iota(jnp.int32, (BL, 1), 0),
                  SEQ_LEN).astype(jnp.float32)                      # (BL, 1)
    h = jnp.where(pos <= aux[0:1, :], h, 0.0)                       # thresh row = L - fs(col)

    # ---- max-over-time, then linear head ------------------------------------------
    pooled = jnp.max(h.reshape(BATCH, SEQ_LEN, NF_TOTAL), axis=1)   # (B, NF_TOTAL)

    # Dropout(p=0.5) is identity in eval/inference mode.
    # TODO(synk): training-mode dropout (stateful PRNG mask) not implemented.
    fcw = params_ref[ROW_FCW:ROW_FCW + NF_TOTAL, :]                 # (NF_TOTAL, NF_TOTAL), cols>=O zero
    logits = jnp.dot(pooled, fcw, preferred_element_type=jnp.float32) + aux[1:2, :]
    out_ref[...] = logits[:, :OUTPUT_DIM]


@jax.jit
def cnn_forward(token_ids, emb_table, conv_ws, conv_bs, fc_w, fc_b):
    B, L = token_ids.shape
    assert B == BATCH and L == SEQ_LEN
    assert NF_TOTAL >= OUTPUT_DIM

    # ---- ids: flatten & pad (padded tail only ever feeds masked im2col rows) ------
    ids_flat = token_ids.reshape(B * L).astype(jnp.int32)
    ids_pad = jnp.full((BL_PAD,), PADDING_IDX, jnp.int32).at[:B * L].set(ids_flat)
    ids_pad = ids_pad.reshape(BL_PAD, 1)

    # ---- one packed parameter slab (layout plumbing stays in the wrapper) ---------
    table = emb_table.astype(jnp.float32)                           # (V, E)
    width_blocks = []
    for w, fs in zip(conv_ws, FILTER_SIZES):
        # Conv1d weight (F, E, fs): fold table into each tap -> (V, F); zero taps >= fs.
        taps = [table @ w[:, :, k].T.astype(jnp.float32) for k in range(fs)]
        taps += [jnp.zeros((VOCAB_SIZE, NUM_FILTERS), jnp.float32)] * (MAX_FS - fs)
        width_blocks.append(jnp.concatenate(taps, axis=0))          # (MAX_FS*V, F)
    w_fold = jnp.concatenate(width_blocks, axis=1)                  # (K_FOLD, NF_TOTAL)
    conv_bias_row = jnp.concatenate(list(conv_bs)).reshape(1, NF_TOTAL).astype(jnp.float32)
    w_fold = jnp.concatenate(
        [w_fold, conv_bias_row,
         jnp.zeros((K_PAD - K_FOLD - 1, NF_TOTAL), jnp.float32)], axis=0)   # (K_PAD, 24)

    fc_slab = jnp.zeros((NF_TOTAL, NF_TOTAL), jnp.float32)
    fc_slab = fc_slab.at[:, :OUTPUT_DIM].set(fc_w.T.astype(jnp.float32))    # (24, 24)

    thresh_row = jnp.array(
        [SEQ_LEN - fs for fs in FILTER_SIZES for _ in range(NUM_FILTERS)],
        jnp.float32).reshape(1, NF_TOTAL)
    fcb_row = jnp.zeros((1, NF_TOTAL), jnp.float32).at[0, :OUTPUT_DIM].set(
        fc_b.astype(jnp.float32))
    aux = jnp.concatenate([thresh_row, fcb_row,
                           jnp.zeros((6, NF_TOTAL), jnp.float32)], axis=0)  # (8, 24)

    params = jnp.concatenate([w_fold, fc_slab, aux], axis=0)        # (PARAM_ROWS, NF_TOTAL)

    vmem = pl.BlockSpec(memory_space=pltpu.MemorySpace.VMEM)
    return pl.pallas_call(
        cnn_kernel,
        out_shape=jax.ShapeDtypeStruct((B, OUTPUT_DIM), jnp.float32),
        in_specs=[vmem, vmem],
        out_specs=vmem,
    )(ids_pad, params)


def cnn_forward_ref(token_ids, emb_table, conv_ws, conv_bs, fc_w, fc_b):
    """Pure-JAX reference mirroring the PyTorch forward (NCL Conv1d semantics)."""
    emb = jnp.take(emb_table, token_ids, axis=0)          # (B, L, E)
    emb_ncl = jnp.transpose(emb, (0, 2, 1))               # (B, E, L)  == .permute(0,2,1)
    pooled = []
    for w, b in zip(conv_ws, conv_bs):
        conv = lax.conv_general_dilated(
            emb_ncl, w, window_strides=(1,), padding='VALID',
            dimension_numbers=('NCH', 'OIH', 'NCH')) + b[None, :, None]
        conv = jnp.maximum(conv, 0.0)
        pooled.append(jnp.max(conv, axis=2))              # (B, F)
    cat = jnp.concatenate(pooled, axis=1)
    return cat @ fc_w.T + fc_b[None, :]


if __name__ == "__main__":
    key = jax.random.PRNGKey(0)
    keys = jax.random.split(key, 8)

    emb_table = 0.1 * jax.random.normal(keys[0], (VOCAB_SIZE, EMBED_DIM), jnp.float32)
    emb_table = emb_table.at[PADDING_IDX].set(0.0)        # nn.Embedding zeros the padding row

    conv_ws = tuple(
        0.1 * jax.random.normal(keys[1 + i], (NUM_FILTERS, EMBED_DIM, fs), jnp.float32)
        for i, fs in enumerate(FILTER_SIZES)
    )
    conv_bs = tuple(
        0.1 * jax.random.normal(keys[4 + i], (NUM_FILTERS,), jnp.float32)
        for i in range(len(FILTER_SIZES))
    )
    fc_w = 0.1 * jax.random.normal(
        keys[7], (OUTPUT_DIM, len(FILTER_SIZES) * NUM_FILTERS), jnp.float32)
    fc_b = jnp.zeros((OUTPUT_DIM,), jnp.float32)

    token_ids = jax.random.randint(
        jax.random.PRNGKey(42), (BATCH, SEQ_LEN), 0, VOCAB_SIZE, dtype=jnp.int32)

    out = cnn_forward(token_ids, emb_table, conv_ws, conv_bs, fc_w, fc_b)
    jax.block_until_ready(out)

    ref = cnn_forward_ref(token_ids, emb_table, conv_ws, conv_bs, fc_w, fc_b)
    assert out.shape == (BATCH, OUTPUT_DIM), out.shape
    assert jnp.allclose(out, ref, atol=1e-5, rtol=1e-5), (out, ref)

    print("KERNEL_OK")
</pallas_src>

<mosaic_0001>
module attributes {stable_mosaic.version = 11 : i64} {
  func.func @cnn_kernel(%arg0: memref<36x1xi32, #tpu.memory_space<vmem>>, %arg1: memref<288x24xf32, #tpu.memory_space<vmem>>, %arg2: memref<2x4xf32, #tpu.memory_space<vmem>>) attributes {dimension_semantics = [], scalar_prefetch = 0 : i64, scratch_operands = 0 : i64, tpu.core_type = #tpu.core_type<tc>} {
    %c0 = arith.constant 0 : index
    %c0_0 = arith.constant 0 : index
    %0 = vector.load %arg0[%c0, %c0_0] : memref<36x1xi32, #tpu.memory_space<vmem>>, vector<36x1xi32>
    %1 = tpu.iota {dimensions = array<i32: 1>} : vector<32x256xi32>
    %c250_i32 = arith.constant 250 : i32
    %2 = vector.broadcast %c250_i32 : i32 to vector<32x256xi32>
    %3 = arith.cmpi eq, %1, %2 : vector<32x256xi32>
    %4 = arith.extui %3 : vector<32x256xi1> to vector<32x256xi32>
    %5 = arith.sitofp %4 : vector<32x256xi32> to vector<32x256xf32>
    %6 = vector.extract_strided_slice %0 {offsets = [0, 0], sizes = [32, 1], strides = [1, 1]} : vector<36x1xi32> to vector<32x1xi32>
    %c0_i32 = arith.constant 0 : i32
    %7 = vector.broadcast %c0_i32 : i32 to vector<32x1xi32>
    %8 = arith.addi %6, %7 : vector<32x1xi32>
    %9 = vector.broadcast %8 : vector<32x1xi32> to vector<32x256xi32>
    %10 = arith.cmpi eq, %1, %9 : vector<32x256xi32>
    %11 = arith.extui %10 : vector<32x256xi1> to vector<32x256xi32>
    %12 = arith.sitofp %11 : vector<32x256xi32> to vector<32x256xf32>
    %13 = arith.addf %5, %12 : vector<32x256xf32>
    %14 = vector.extract_strided_slice %0 {offsets = [1, 0], sizes = [32, 1], strides = [1, 1]} : vector<36x1xi32> to vector<32x1xi32>
    %c50_i32 = arith.constant 50 : i32
    %15 = vector.broadcast %c50_i32 : i32 to vector<32x1xi32>
    %16 = arith.addi %14, %15 : vector<32x1xi32>
    %17 = vector.broadcast %16 : vector<32x1xi32> to vector<32x256xi32>
    %18 = arith.cmpi eq, %1, %17 : vector<32x256xi32>
    %19 = arith.extui %18 : vector<32x256xi1> to vector<32x256xi32>
    %20 = arith.sitofp %19 : vector<32x256xi32> to vector<32x256xf32>
    %21 = arith.addf %13, %20 : vector<32x256xf32>
    %22 = vector.extract_strided_slice %0 {offsets = [2, 0], sizes = [32, 1], strides = [1, 1]} : vector<36x1xi32> to vector<32x1xi32>
    %c100_i32 = arith.constant 100 : i32
    %23 = vector.broadcast %c100_i32 : i32 to vector<32x1xi32>
    %24 = arith.addi %22, %23 : vector<32x1xi32>
    %25 = vector.broadcast %24 : vector<32x1xi32> to vector<32x256xi32>
    %26 = arith.cmpi eq, %1, %25 : vector<32x256xi32>
    %27 = arith.extui %26 : vector<32x256xi1> to vector<32x256xi32>
    %28 = arith.sitofp %27 : vector<32x256xi32> to vector<32x256xf32>
    %29 = arith.addf %21, %28 : vector<32x256xf32>
    %30 = vector.extract_strided_slice %0 {offsets = [3, 0], sizes = [32, 1], strides = [1, 1]} : vector<36x1xi32> to vector<32x1xi32>
    %c150_i32 = arith.constant 150 : i32
    %31 = vector.broadcast %c150_i32 : i32 to vector<32x1xi32>
    %32 = arith.addi %30, %31 : vector<32x1xi32>
    %33 = vector.broadcast %32 : vector<32x1xi32> to vector<32x256xi32>
    %34 = arith.cmpi eq, %1, %33 : vector<32x256xi32>
    %35 = arith.extui %34 : vector<32x256xi1> to vector<32x256xi32>
    %36 = arith.sitofp %35 : vector<32x256xi32> to vector<32x256xf32>
    %37 = arith.addf %29, %36 : vector<32x256xf32>
    %38 = vector.extract_strided_slice %0 {offsets = [4, 0], sizes = [32, 1], strides = [1, 1]} : vector<36x1xi32> to vector<32x1xi32>
    %c200_i32 = arith.constant 200 : i32
    %39 = vector.broadcast %c200_i32 : i32 to vector<32x1xi32>
    %40 = arith.addi %38, %39 : vector<32x1xi32>
    %41 = vector.broadcast %40 : vector<32x1xi32> to vector<32x256xi32>
    %42 = arith.cmpi eq, %1, %41 : vector<32x256xi32>
    %43 = arith.extui %42 : vector<32x256xi1> to vector<32x256xi32>
    %44 = arith.sitofp %43 : vector<32x256xi32> to vector<32x256xf32>
    %45 = arith.addf %37, %44 : vector<32x256xf32>
    %c0_1 = arith.constant 0 : index
    %c0_2 = arith.constant 0 : index
    %46 = vector.load %arg1[%c0_1, %c0_2] : memref<288x24xf32, #tpu.memory_space<vmem>>, vector<256x24xf32>
    %cst = arith.constant dense<0.000000e+00> : vector<32x24xf32>
    %47 = tpu.matmul %45, %46, %cst {dimension_numbers = #tpu.dot_dimension_numbers<[1], [0], [0], [1], [0, 0, 1, 1], [], []>} : vector<32x256xf32>, vector<256x24xf32>, vector<32x24xf32> -> vector<32x24xf32>
    %cst_3 = arith.constant 0.000000e+00 : f32
    %48 = vector.broadcast %cst_3 : f32 to vector<32x24xf32>
    %49 = arith.maximumf %47, %48 : vector<32x24xf32>
    %c280 = arith.constant 280 : index
    %c0_4 = arith.constant 0 : index
    %50 = vector.load %arg1[%c280, %c0_4] : memref<288x24xf32, #tpu.memory_space<vmem>>, vector<8x24xf32>
    %51 = tpu.iota {dimensions = array<i32: 0>} : vector<32x1xi32>
    %c16_i32 = arith.constant 16 : i32
    %52 = vector.broadcast %c16_i32 : i32 to vector<32x1xi32>
    %53 = arith.remsi %51, %52 : vector<32x1xi32>
    %54 = arith.sitofp %53 : vector<32x1xi32> to vector<32x1xf32>
    %55 = vector.extract_strided_slice %50 {offsets = [0, 0], sizes = [1, 24], strides = [1, 1]} : vector<8x24xf32> to vector<1x24xf32>
    %56 = vector.broadcast %54 : vector<32x1xf32> to vector<32x24xf32>
    %57 = vector.broadcast %55 : vector<1x24xf32> to vector<32x24xf32>
    %58 = arith.cmpf ole, %56, %57 : vector<32x24xf32>
    %cst_5 = arith.constant 0.000000e+00 : f32
    %59 = vector.broadcast %cst_5 : f32 to vector<32x24xf32>
    %60 = arith.select %58, %49, %59 : vector<32x24xi1>, vector<32x24xf32>
    %61 = vector.shape_cast %60 : vector<32x24xf32> to vector<2x16x24xf32>
    %cst_6 = arith.constant dense<0xFF800000> : vector<2x24xf32>
    %62 = vector.multi_reduction <maximumf>, %61, %cst_6 [1] : vector<2x16x24xf32> to vector<2x24xf32>
    %c256 = arith.constant 256 : index
    %c0_7 = arith.constant 0 : index
    %63 = vector.load %arg1[%c256, %c0_7] : memref<288x24xf32, #tpu.memory_space<vmem>>, vector<24x24xf32>
    %cst_8 = arith.constant dense<0.000000e+00> : vector<2x24xf32>
    %64 = tpu.matmul %62, %63, %cst_8 {dimension_numbers = #tpu.dot_dimension_numbers<[1], [0], [0], [1], [0, 0, 1, 1], [], []>} : vector<2x24xf32>, vector<24x24xf32>, vector<2x24xf32> -> vector<2x24xf32>
    %65 = vector.extract_strided_slice %50 {offsets = [1, 0], sizes = [1, 24], strides = [1, 1]} : vector<8x24xf32> to vector<1x24xf32>
    %66 = vector.broadcast %65 : vector<1x24xf32> to vector<2x24xf32>
    %67 = arith.addf %64, %66 : vector<2x24xf32>
    %68 = vector.extract_strided_slice %67 {offsets = [0, 0], sizes = [2, 4], strides = [1, 1]} : vector<2x24xf32> to vector<2x4xf32>
    %c0_9 = arith.constant 0 : index
    %c0_10 = arith.constant 0 : index
    %69 = vector.load %arg2[%c0_9, %c0_10] : memref<2x4xf32, #tpu.memory_space<vmem>>, vector<2x4xf32>
    tpu.vector_store %arg2[%c0_9, %c0_10], %68 {strides = array<i32>} : memref<2x4xf32, #tpu.memory_space<vmem>>, vector<2x4xf32>,
    return
  }
}

</mosaic_0001>

<bundles_post_ra>
// kernel: cnn_forward.1
= control target key start
LH: loop header
LB: loop body
LE: loop exit
PB: predicated region body
PF: predicated region fallthrough
CT: control target
= control target key end

     0   :  { %v928_v2 = vmov 0   ;;  %s1363_s0 = inlined_call_operand.vmem [shape: s32[36,1], index: 0, kind: input, shape index: {}]   ;;  %s1364_s1 = inlined_call_operand.vmem [shape: f32[288,24], index: 1, kind: input, shape index: {}]   ;;  %s1365_s2 = inlined_call_operand.hbm [shape: f32[2,4], index: 2, kind: output, shape index: {}]  }
   0x1   :  { %v951_v0 = vld [vmem:[%s1363_s0] sm:$0xff]  ;;  %v956_v1 = vld [vmem:[%s1363_s0 + $0x8] sm:$0xff]  ;;  %903 = vset.pattern.permute.xlu1 %v928_v2  ;;  %902 = vset.pattern.permute.xlu0 %v928_v2  ;;  %v964_v5 = vld [vmem:[%s1363_s0 + $0x10] sm:$0xff] }
   0x2   :  { %v70_v3 = vadd.s32 50, %v951_v0  ;;  %27 = vperm.xlu1 %903, %v951_v0   ;;  %v165_v4 = vadd.s32 100, %v951_v0  ;;  %v71_v6 = vadd.s32 50, %v956_v1  ;;  %v466_v7 = vld [vmem:[%s1364_s1 + $0x80] sm:$0xff]  ;;  %v467_v8 = vld [vmem:[%s1364_s1 + $0x88] sm:$0xff]  ;;  %v468_v11 = vld [vmem:[%s1364_s1 + $0x90] sm:$0xff] }
   0x3   :  { %v450_v9 = vld [vmem:[%s1364_s1] sm:$0xff]  ;;  %v451_v10 = vld [vmem:[%s1364_s1 + $0x8] sm:$0xff]  ;;  %v469_v12 = vld [vmem:[%s1364_s1 + $0x98] sm:$0xff]  ;;  %v72_v13 = vadd.s32 50, %v964_v5  ;;  %v846_v14 = vpack.c.bf16 %v467_v8, %v466_v7  ;;  %v166_v19 = vadd.s32 100, %v956_v1 }
   0x4   :  { %76 = vperm.xlu0 %902, %v70_v3   ;;  %v848_v15 = vpack.c.bf16 %v451_v10, %v450_v9  ;;  %v850_v16 = vpack.c.bf16 %v469_v12, %v468_v11  ;;  %v452_v17 = vld [vmem:[%s1364_s1 + $0x10] sm:$0xff]  ;;  %v453_v18 = vld [vmem:[%s1364_s1 + $0x18] sm:$0xff]  ;;  %v470_v20 = vld [vmem:[%s1364_s1 + $0xa0] sm:$0xff] }
   0x5   :  { %v471_v21 = vld [vmem:[%s1364_s1 + $0xa8] sm:$0xff] }
   0x6   :  { %171 = vperm.xlu1 %903, %v165_v4  }
   0x8   :  { %79 = vperm.xlu0 %902, %v71_v6  }
   0x9   :  { %7 = vsyncpa [#allocation3], 0  ;;  %847 = vmatprep.subr.bf16.mxu0 %v846_v14  ;;  %881 = vmatprep.subr.bf16.mxu1 %v846_v14  ;;  %v852_v22 = vpack.c.bf16 %v453_v18, %v452_v17  ;;  %v261_v23 = vadd.s32 150, %v956_v1  ;;  %v854_v24 = vpack.c.bf16 %v471_v21, %v470_v20  ;;  %v454_v25 = vld [vmem:[%s1364_s1 + $0x20] sm:$0xff]  ;;  %v455_v26 = vld [vmem:[%s1364_s1 + $0x28] sm:$0xff]  ;;  %v260_v27 = vadd.s32 150, %v951_v0 }
   0xa   :  { %849 = vmatpush3.bf16.msra.mxu0 %v848_v15  ;;  %889 = vmatpush3.bf16.msra.mxu1 %v848_v15  ;;  %v472_v28 = vld [vmem:[%s1364_s1 + $0xb0] sm:$0xff]  ;;  %v473_v29 = vld [vmem:[%s1364_s1 + $0xb8] sm:$0xff]  ;;  %v856_v30 = vpack.c.bf16 %v455_v26, %v454_v25  ;;  %v167_v31 = vadd.s32 100, %v964_v5  ;;  %v474_v35 = vld [vmem:[%s1364_s1 + $0xc0] sm:$0xff]  ;;  %v356_v38 = vadd.s32 200, %v956_v1  ;;  %v355_v42 = vadd.s32 200, %v951_v0 }
   0xb   :  { %82 = vperm.xlu1 %903, %v72_v13   ;;  %851 = vmatprep.subr.bf16.mxu0 %v850_v16  ;;  %v858_v32 = vpack.c.bf16 %v473_v29, %v472_v28  ;;  %v456_v33 = vld [vmem:[%s1364_s1 + $0x30] sm:$0xff]  ;;  %v457_v34 = vld [vmem:[%s1364_s1 + $0x38] sm:$0xff]  ;;  %v475_v36 = vld [vmem:[%s1364_s1 + $0xc8] sm:$0xff]  ;;  %v262_v59 = vadd.s32 150, %v964_v5  ;;  %v357_v4 = vadd.s32 200, %v964_v5  ;;  %v17_v11 = vlaneseq }
   0xc   :  { %174 = vperm.xlu0 %902, %v166_v19   ;;  %882 = vmatprep.subr.bf16.mxu1 %v850_v16  ;;  %v860_v37 = vpack.c.bf16 %v457_v34, %v456_v33  ;;  %v862_v39 = vpack.c.bf16 %v475_v36, %v474_v35  ;;  %v458_v40 = vld [vmem:[%s1364_s1 + $0x40] sm:$0xff]  ;;  %v459_v41 = vld [vmem:[%s1364_s1 + $0x48] sm:$0xff]  ;;  %v476_v44 = vld [vmem:[%s1364_s1 + $0xd0] sm:$0xff]  ;;  %v929_v15 = vmov 0.0   ;;  %vm130_vm5 = vcmask 1046528  }
   0xd   :  { %v16_v43 = vld [vmem:[%s1363_s0 + $0x20] sm:$0xf]  ;;  %v477_v45 = vld [vmem:[%s1364_s1 + $0xd8] sm:$0xff]  ;;  %v864_v47 = vpack.c.bf16 %v459_v41, %v458_v40  ;;  %v460_v50 = vld [vmem:[%s1364_s1 + $0x50] sm:$0xff]  ;;  %v1081_v12 = vand.u32 127, %v17_v11  ;;  %vm225_vm8 = vcmask 1045504  }
   0xe   :  { %853 = vmatpush3.bf16.msra.mxu0 %v852_v22  ;;  %890 = vmatpush3.bf16.msra.mxu1 %v852_v22  ;;  %v15_v46 = vld [vmem:[%s1363_s0 + $0x18] sm:$0xff]  ;;  %v74_v48 = vadd.s32 50, %v16_v43  ;;  %v866_v49 = vpack.c.bf16 %v477_v45, %v476_v44  ;;  %v478_v53 = vld [vmem:[%s1364_s1 + $0xe0] sm:$0xff]  ;;  %v479_v54 = vld [vmem:[%s1364_s1 + $0xe8] sm:$0xff]  ;;  %v169_v6 = vadd.s32 100, %v16_v43  ;;  %v264_v7 = vadd.s32 150, %v16_v43 }
   0xf   :  { %269 = vperm.xlu1 %903, %v261_v23   ;;  %855 = vmatprep.subr.bf16.mxu0 %v854_v24  ;;  %v461_v51 = vld [vmem:[%s1364_s1 + $0x58] sm:$0xff]  ;;  %v73_v52 = vadd.s32 50, %v15_v46  ;;  %v870_v56 = vpack.c.bf16 %v479_v54, %v478_v53  ;;  %v462_v57 = vld [vmem:[%s1364_s1 + $0x60] sm:$0xff]  ;;  %v463_v58 = vld [vmem:[%s1364_s1 + $0x68] sm:$0xff]  ;;  %v168_v63 = vadd.s32 100, %v15_v46  ;;  %v263_v8 = vadd.s32 150, %v15_v46 }
  0x10   :  { %266 = vperm.xlu0 %902, %v260_v27   ;;  %883 = vmatprep.subr.bf16.mxu1 %v854_v24  ;;  %v868_v55 = vpack.c.bf16 %v461_v51, %v460_v50  ;;  %v480_v60 = vld [vmem:[%s1364_s1 + $0xf0] sm:$0xff]  ;;  %v481_v61 = vld [vmem:[%s1364_s1 + $0xf8] sm:$0xff]  ;;  %v872_v62 = vpack.c.bf16 %v463_v58, %v462_v57  ;;  %v359_v9 = vadd.s32 200, %v16_v43  ;;  %v358_v10 = vadd.s32 200, %v15_v46 }
  0x11   :  { %v874_v0 = vpack.c.bf16 %v481_v61, %v480_v60  ;;  %v465_v2 = vld [vmem:[%s1364_s1 + $0x78] sm:$0xff]  ;;  %vm320_vm13 = vcmask 1044480  }
  0x12   :  { %857 = vmatpush3.bf16.msra.mxu0 %v856_v30  ;;  %891 = vmatpush3.bf16.msra.mxu1 %v856_v30 }
  0x13   :  { %177 = vperm.xlu1 %903, %v167_v31   ;;  %859 = vmatprep.subr.bf16.mxu0 %v858_v32 }
  0x14   :  { %30 = vperm.xlu0 %902, %v956_v1   ;;  %884 = vmatprep.subr.bf16.mxu1 %v858_v32  ;;  %v464_v1 = vld [vmem:[%s1364_s1 + $0x70] sm:$0xff] }
  0x15   :  { %v876_v3 = vpack.c.bf16 %v465_v2, %v464_v1 }
  0x16   :  { %861 = vmatpush3.bf16.msra.mxu0 %v860_v37  ;;  %892 = vmatpush3.bf16.msra.mxu1 %v860_v37 }
  0x17   :  { %364 = vperm.xlu1 %903, %v356_v38   ;;  %863 = vmatprep.subr.bf16.mxu0 %v862_v39 }
  0x18   :  { %361 = vperm.xlu0 %902, %v355_v42   ;;  %885 = vmatprep.subr.bf16.mxu1 %v862_v39 }
  0x1a   :  { %865 = vmatpush3.bf16.msra.mxu0 %v864_v47  ;;  %893 = vmatpush3.bf16.msra.mxu1 %v864_v47 }
  0x1b   :  { %88 = vperm.xlu1 %903, %v74_v48   ;;  %867 = vmatprep.subr.bf16.mxu0 %v866_v49 }
  0x1c   :  { %85 = vperm.xlu0 %902, %v73_v52   ;;  %886 = vmatprep.subr.bf16.mxu1 %v866_v49 }
  0x1e   :  { %869 = vmatpush3.bf16.msra.mxu0 %v868_v55  ;;  %894 = vmatpush3.bf16.msra.mxu1 %v868_v55 }
  0x1f   :  { %33 = vperm.xlu1 %903, %v964_v5   ;;  %871 = vmatprep.subr.bf16.mxu0 %v870_v56  ;;  %v1084_v5 = vadd.s32 128, %v1081_v12 }
  0x20   :  { %272 = vperm.xlu0 %902, %v262_v59   ;;  %887 = vmatprep.subr.bf16.mxu1 %v870_v56 }
  0x21   :  { %vm21_vm0 = vcmp.eq.s32.totalorder %v1084_v5, 250 }
  0x22   :  { %873 = vmatpush3.bf16.msra.mxu0 %v872_v62  ;;  %895 = vmatpush3.bf16.msra.mxu1 %v872_v62  ;;  %v1091_v16 = vsel %vm21_vm0, 1.0, %v929_v15 }
  0x23   :  { %180 = vperm.xlu1 %903, %v168_v63   ;;  %875 = vmatprep.subr.bf16.mxu0 %v874_v0 }
  0x24   :  { %36 = vperm.xlu0 %902, %v15_v46   ;;  %888 = vmatprep.subr.bf16.mxu1 %v874_v0 }
  0x26   :  { %877 = vmatpush3.bf16.msra.mxu0 %v876_v3  ;;  %896 = vmatpush3.bf16.msra.mxu1 %v876_v3 }
  0x27   :  { %367 = vperm.xlu1 %903, %v357_v4  }
  0x28   :  { %183 = vperm.xlu0 %902, %v169_v6  }
  0x2b   :  { %278 = vperm.xlu1 %903, %v264_v7  }
  0x2c   :  { %275 = vperm.xlu0 %902, %v263_v8  }
  0x2f   :  { %373 = vperm.xlu1 %903, %v359_v9  }
  0x30   :  { %370 = vperm.xlu0 %902, %v358_v10  }
  0x81   :  { %v28_v13 = vpop.permute.xlu1 %27 }
  0x82   :  { %vm39_vm1 = vcmp.eq.s32.totalorder %v1084_v5, %v28_v13  ;;  %vm38_vm4 = vcmp.eq.s32.totalorder %v1081_v12, %v28_v13 }
  0x83   :  { %v77_v14 = vpop.permute.xlu0 %76  ;;  %v741_v17 = vsel %vm39_vm1, 1.0, %v929_v15  ;;  %v740_v23 = vsel %vm38_vm4, 1.0, %v929_v15 }
  0x84   :  { %vm90_vm2 = vcmp.eq.s32.totalorder %v1081_v12, %v77_v14  ;;  %vm91_vm3 = vcmp.eq.s32.totalorder %v1084_v5, %v77_v14  ;;  %v63_v24 = vadd.f32 %v741_v17, %v1091_v16 }
  0x85   :  { %v172_v18 = vpop.permute.xlu1 %171  ;;  %v748_v19 = vsel %vm90_vm2, 1.0, %v929_v15  ;;  %v749_v21 = vsel %vm91_vm3, 1.0, %v929_v15 }
  0x86   :  { %vm185_vm6 = vcmp.eq.s32.totalorder %v1081_v12, %v172_v18  ;;  %vm186_vm7 = vcmp.eq.s32.totalorder %v1084_v5, %v172_v18  ;;  %v131_v27 = vrot.slane %v748_v19, 1  ;;  %v134_v32 = vrot.slane %v749_v21, 1 }
  0x87   :  { %v80_v20 = vpop.permute.xlu0 %79  ;;  %v758_v22 = vsel %vm185_vm6, 1.0, %v929_v15  ;;  %v759_v28 = vsel %vm186_vm7, 1.0, %v929_v15  ;;  %vm415_vm7 = vcmask 1043456  }
  0x88   :  { %vm92_vm9 = vcmp.eq.s32.totalorder %v1081_v12, %v80_v20  ;;  %vm93_vm10 = vcmp.eq.s32.totalorder %v1084_v5, %v80_v20  ;;  %v226_v33 = vrot.slane %v758_v22, 2  ;;  %v229_v38 = vrot.slane %v759_v28, 2 }
  0x89   :  { %v750_v25 = vsel %vm92_vm9, 1.0, %v929_v15  ;;  %v751_v26 = vsel %vm93_vm10, 1.0, %v929_v15 }
  0x8a   :  { %v132_v29 = vrot.slane %v750_v25, 1  ;;  %v135_v30 = vrot.slane %v751_v26, 1  ;;  %v83_v31 = vpop.permute.xlu1 %82 }
  0x8b   :  { %vm94_vm11 = vcmp.eq.s32.totalorder %v1081_v12, %v83_v31  ;;  %vm95_vm12 = vcmp.eq.s32.totalorder %v1084_v5, %v83_v31  ;;  %v175_v34 = vpop.permute.xlu0 %174 }
  0x8c   :  { %v133_v35 = vsel %vm130_vm5, %v131_v27, %v132_v29  ;;  %v1111_v36 = vsel %vm94_vm11, 1.0, %v929_v15  ;;  %v1114_v37 = vsel %vm95_vm12, 1.0, %v929_v15  ;;  %vm187_vm14 = vcmp.eq.s32.totalorder %v1081_v12, %v175_v34 }
  0x8d   :  { %v1117_v39 = vadd.f32 %v740_v23, %v133_v35  ;;  %v137_v40 = vrot.slane %v1111_v36, 1  ;;  %vm188_vm15 = vcmp.eq.s32.totalorder %v1084_v5, %v175_v34  ;;  %v139_v41 = vrot.slane %v1114_v37, 1 }
  0x8e   :  { %v760_v42 = vsel %vm187_vm14, 1.0, %v929_v15  ;;  %v761_v43 = vsel %vm188_vm15, 1.0, %v929_v15  ;;  %v270_v44 = vpop.permute.xlu1 %269  ;;  %v136_v45 = vsel %vm130_vm5, %v134_v32, %v135_v30 }
  0x8f   :  { %v227_v46 = vrot.slane %v760_v42, 2  ;;  %v230_v47 = vrot.slane %v761_v43, 2  ;;  %vm282_vm0 = vcmp.eq.s32.totalorder %v1081_v12, %v270_v44  ;;  %vm283_vm1 = vcmp.eq.s32.totalorder %v1084_v5, %v270_v44  ;;  %v267_v48 = vpop.permute.xlu0 %266 }
  0x90   :  { %v1128_v49 = vsel %vm282_vm0, 1.0, %v929_v15  ;;  %v1131_v50 = vsel %vm283_vm1, 1.0, %v929_v15  ;;  %vm280_vm2 = vcmp.eq.s32.totalorder %v1081_v12, %v267_v48  ;;  %vm281_vm3 = vcmp.eq.s32.totalorder %v1084_v5, %v267_v48 }
  0x91   :  { %v1136_v51 = vsel %vm225_vm8, %v226_v33, %v227_v46  ;;  %v322_v52 = vrot.slane %v1128_v49, 3  ;;  %v325_v53 = vrot.slane %v1131_v50, 3  ;;  %v1141_v54 = vsel %vm280_vm2, 1.0, %v929_v15 }
  0x92   :  { %v769_v55 = vsel %vm281_vm3, 1.0, %v929_v15  ;;  %v321_v56 = vrot.slane %v1141_v54, 3  ;;  %v178_v57 = vpop.permute.xlu1 %177  ;;  %v138_v58 = vsel %vm130_vm5, %v132_v29, %v137_v40  ;;  %v140_v59 = vsel %vm130_vm5, %v135_v30, %v139_v41 }
  0x93   :  { %v324_v60 = vrot.slane %v769_v55, 3  ;;  %vm189_vm4 = vcmp.eq.s32.totalorder %v1081_v12, %v178_v57  ;;  %vm190_vm6 = vcmp.eq.s32.totalorder %v1084_v5, %v178_v57  ;;  %v31_v61 = vpop.permute.xlu0 %30  ;;  %v158_v62 = vadd.f32 %v136_v45, %v63_v24 }
  0x94   :  { %v1154_v63 = vsel %vm189_vm4, 1.0, %v929_v15  ;;  %v1157_v0 = vsel %vm190_vm6, 1.0, %v929_v15  ;;  %vm40_vm9 = vcmp.eq.s32.totalorder %v1081_v12, %v31_v61  ;;  %vm41_vm10 = vcmp.eq.s32.totalorder %v1084_v5, %v31_v61 }
  0x95   :  { %v232_v1 = vrot.slane %v1154_v63, 2  ;;  %v234_v2 = vrot.slane %v1157_v0, 2  ;;  %v742_v3 = vsel %vm40_vm9, 1.0, %v929_v15  ;;  %v743_v4 = vsel %vm41_vm10, 1.0, %v929_v15 }
  0x96   :  { %v65_v6 = vadd.f32 %v743_v4, %v1091_v16  ;;  %v159_v7 = vadd.f32 %v742_v3, %v138_v58  ;;  %v365_v8 = vpop.permute.xlu1 %364  ;;  %v231_v9 = vsel %vm225_vm8, %v229_v38, %v230_v47  ;;  %v326_v10 = vsel %vm320_vm13, %v324_v60, %v325_v53 }
  0x97   :  { %v235_v13 = vsel %vm225_vm8, %v230_v47, %v234_v2  ;;  %v233_v14 = vsel %vm225_vm8, %v227_v46, %v232_v1  ;;  %vm377_vm11 = vcmp.eq.s32.totalorder %v1081_v12, %v365_v8  ;;  %vm378_vm12 = vcmp.eq.s32.totalorder %v1084_v5, %v365_v8  ;;  %v362_v17 = vpop.permute.xlu0 %361 }
  0x98   :  { %v160_v18 = vadd.f32 %v140_v59, %v65_v6  ;;  %v1178_v19 = vadd.f32 %v233_v14, %v159_v7  ;;  %v1181_v20 = vsel %vm377_vm11, 1.0, %v929_v15  ;;  %v1184_v21 = vsel %vm378_vm12, 1.0, %v929_v15 }
  0x99   :  { %v417_v22 = vrot.slane %v1181_v20, 4  ;;  %v420_v23 = vrot.slane %v1184_v21, 4  ;;  %vm375_vm14 = vcmp.eq.s32.totalorder %v1081_v12, %v362_v17  ;;  %vm376_vm15 = vcmp.eq.s32.totalorder %v1084_v5, %v362_v17 }
  0x9a   :  { %v1190_v24 = vadd.f32 %v235_v13, %v160_v18  ;;  %v778_v25 = vsel %vm375_vm14, 1.0, %v929_v15  ;;  %v779_v26 = vsel %vm376_vm15, 1.0, %v929_v15  ;;  %v89_v27 = vpop.permute.xlu1 %88  ;;  %v253_v28 = vadd.f32 %v231_v9, %v158_v62 }
  0x9b   :  { %v416_v29 = vrot.slane %v778_v25, 4  ;;  %v419_v30 = vrot.slane %v779_v26, 4  ;;  %vm98_vm0 = vcmp.eq.s32.totalorder %v1081_v12, %v89_v27  ;;  %vm99_vm1 = vcmp.eq.s32.totalorder %v1084_v5, %v89_v27  ;;  %v86_v31 = vpop.permute.xlu0 %85 }
  0x9c   :  { %v756_v32 = vsel %vm98_vm0, 1.0, %v929_v15  ;;  %v757_v33 = vsel %vm99_vm1, 1.0, %v929_v15  ;;  %vm96_vm2 = vcmp.eq.s32.totalorder %v1081_v12, %v86_v31  ;;  %vm97_vm3 = vcmp.eq.s32.totalorder %v1084_v5, %v86_v31 }
  0x9d   :  { %v145_v34 = vrot.slane %v756_v32, 1  ;;  %v147_v35 = vrot.slane %v757_v33, 1  ;;  %v754_v38 = vsel %vm96_vm2, 1.0, %v929_v15  ;;  %v755_v42 = vsel %vm97_vm3, 1.0, %v929_v15 }
  0x9e   :  { %v141_v43 = vrot.slane %v754_v38, 1  ;;  %v143_v44 = vrot.slane %v755_v42, 1  ;;  %v34_v45 = vpop.permute.xlu1 %33  ;;  %v348_v46 = vadd.f32 %v326_v10, %v253_v28  ;;  %v421_v47 = vsel %vm415_vm7, %v419_v30, %v420_v23 }
  0x9f   :  { %vm42_vm4 = vcmp.eq.s32.totalorder %v1081_v12, %v34_v45  ;;  %vm43_vm6 = vcmp.eq.s32.totalorder %v1084_v5, %v34_v45  ;;  %v273_v48 = vpop.permute.xlu0 %272  ;;  %v252_v55 = vadd.f32 %v1136_v51, %v1117_v39  ;;  %v323_v57 = vsel %vm320_vm13, %v321_v56, %v322_v52 }
  0xa0   :  { %v744_v58 = vsel %vm42_vm4, 1.0, %v929_v15  ;;  %v745_v59 = vsel %vm43_vm6, 1.0, %v929_v15  ;;  %v142_v60 = vsel %vm130_vm5, %v137_v40, %v141_v43  ;;  %v144_v61 = vsel %vm130_vm5, %v139_v41, %v143_v44 }
  0xa1   :  { %v67_v39 = vadd.f32 %v745_v59, %v1091_v16  ;;  %v1223_v51 = vadd.f32 %v744_v58, %v142_v60  ;;  %v443_v62 = vadd.f32 %v421_v47, %v348_v46  ;;  %vm284_vm9 = vcmp.eq.s32.totalorder %v1081_v12, %v273_v48 }
  0xa2   :  { %vm285_vm10 = vcmp.eq.s32.totalorder %v1084_v5, %v273_v48  ;;  %v1228_v54 = vsel %vm284_vm9, 1.0, %v929_v15  ;;  %v347_v56 = vadd.f32 %v323_v57, %v252_v55  ;;  %v418_v36 = vsel %vm415_vm7, %v416_v29, %v417_v22  ;;  %v181_v37 = vpop.permute.xlu1 %180 }
  0xa3   :  { %v1233_v40 = vadd.f32 %v144_v61, %v67_v39  ;;  %546 = vmatprep.mubr.f32.mxu0 %v443_v62  ;;  %v1236_v41 = vsel %vm285_vm10, 1.0, %v929_v15  ;;  %v327_v3 = vrot.slane %v1228_v54, 3  ;;  %vm191_vm11 = vcmp.eq.s32.totalorder %v1081_v12, %v181_v37  ;;  %v37_v4 = vpop.permute.xlu0 %36 }
  0xa4   :  { %v329_v6 = vrot.slane %v1236_v41, 3  ;;  %v442_v7 = vadd.f32 %v418_v36, %v347_v56  ;;  %vm192_vm12 = vcmp.eq.s32.totalorder %v1084_v5, %v181_v37  ;;  %v764_v8 = vsel %vm191_vm11, 1.0, %v929_v15 }
  0xa5   :  { %v1244_v9 = vsel %vm192_vm12, 1.0, %v929_v15  ;;  %v236_v10 = vrot.slane %v764_v8, 2  ;;  %v146_v13 = vsel %vm130_vm5, %v141_v43, %v145_v34  ;;  %v148_v14 = vsel %vm130_vm5, %v143_v44, %v147_v35 }
  0xa6   :  { %547 = vmatmul.mubr.f32.vlgmr.msra.gmra.mrb[0].mxu0 %v442_v7  ;;  %v238_v17 = vrot.slane %v1244_v9, 2  ;;  %vm44_vm14 = vcmp.eq.s32.totalorder %v1081_v12, %v37_v4  ;;  %vm45_vm15 = vcmp.eq.s32.totalorder %v1084_v5, %v37_v4  ;;  %v368_v18 = vpop.permute.xlu1 %367  ;;  %v330_v25 = vsel %vm320_vm13, %v325_v53, %v329_v6 }
  0xa7   :  { %v1259_v26 = vsel %vm225_vm8, %v232_v1, %v236_v10  ;;  %v746_v27 = vsel %vm44_vm14, 1.0, %v929_v15  ;;  %v747_v28 = vsel %vm45_vm15, 1.0, %v929_v15  ;;  %vm379_vm5 = vcmp.eq.s32.totalorder %v1081_v12, %v368_v18  ;;  %v184_v29 = vpop.permute.xlu0 %183 }
  0xa8   :  { %v239_v50 = vsel %vm225_vm8, %v234_v2, %v238_v17  ;;  %v69_v53 = vadd.f32 %v747_v28, %v1091_v16  ;;  %v163_v30 = vadd.f32 %v746_v27, %v146_v13  ;;  %vm380_vm0 = vcmp.eq.s32.totalorder %v1084_v5, %v368_v18 }
  0xa9   :  { %v1272_v63 = vsel %vm379_vm5, 1.0, %v929_v15  ;;  %v783_v1 = vsel %vm380_vm0, 1.0, %v929_v15  ;;  %vm193_vm1 = vcmp.eq.s32.totalorder %v1081_v12, %v184_v29  ;;  %vm194_vm2 = vcmp.eq.s32.totalorder %v1084_v5, %v184_v29 }
  0xaa   :  { %v164_v31 = vadd.f32 %v148_v14, %v69_v53  ;;  %v422_v32 = vrot.slane %v1272_v63, 4  ;;  %v424_v0 = vrot.slane %v783_v1, 4  ;;  %v766_v2 = vsel %vm193_vm1, 1.0, %v929_v15  ;;  %v279_v33 = vpop.permute.xlu1 %278  ;;  %v642_v1 = vld [vmem:[%s1364_s1 + $0x110] sm:$0xff] }
  0xab   :  { %v767_v16 = vsel %vm194_vm2, 1.0, %v929_v15  ;;  %v240_v34 = vrot.slane %v766_v2, 2  ;;  %vm288_vm3 = vcmp.eq.s32.totalorder %v1081_v12, %v279_v33  ;;  %vm289_vm4 = vcmp.eq.s32.totalorder %v1084_v5, %v279_v33  ;;  %v276_v35 = vpop.permute.xlu0 %275 }
  0xac   :  { %v242_v38 = vrot.slane %v767_v16, 2  ;;  %v776_v42 = vsel %vm288_vm3, 1.0, %v929_v15  ;;  %v777_v43 = vsel %vm289_vm4, 1.0, %v929_v15  ;;  %vm286_vm6 = vcmp.eq.s32.totalorder %v1081_v12, %v276_v35 }
  0xad   :  { %v241_v44 = vsel %vm225_vm8, %v236_v10, %v240_v34  ;;  %v335_v45 = vrot.slane %v776_v42, 3  ;;  %v337_v46 = vrot.slane %v777_v43, 3  ;;  %vm287_vm9 = vcmp.eq.s32.totalorder %v1084_v5, %v276_v35 }
  0xae   :  { %v774_v47 = vsel %vm286_vm6, 1.0, %v929_v15  ;;  %v775_v48 = vsel %vm287_vm9, 1.0, %v929_v15  ;;  %v374_v55 = vpop.permute.xlu1 %373  ;;  %v350_v57 = vadd.f32 %v330_v25, %v1190_v24  ;;  %v425_v58 = vsel %vm415_vm7, %v420_v23, %v424_v0 }
  0xaf   :  { %v331_v59 = vrot.slane %v774_v47, 3  ;;  %v333_v60 = vrot.slane %v775_v48, 3  ;;  %vm383_vm10 = vcmp.eq.s32.totalorder %v1081_v12, %v374_v55  ;;  %vm384_vm11 = vcmp.eq.s32.totalorder %v1084_v5, %v374_v55  ;;  %v371_v61 = vpop.permute.xlu0 %370 }
  0xb0   :  { %v786_v39 = vsel %vm383_vm10, 1.0, %v929_v15  ;;  %v787_v62 = vsel %vm384_vm11, 1.0, %v929_v15  ;;  %v445_v56 = vadd.f32 %v425_v58, %v350_v57  ;;  %v328_v21 = vsel %vm320_vm13, %v322_v52, %v327_v3 }
  0xb1   :  { %v430_v24 = vrot.slane %v786_v39, 4  ;;  %v432_v23 = vrot.slane %v787_v62, 4  ;;  %v349_v36 = vadd.f32 %v328_v21, %v1178_v19  ;;  %v423_v37 = vsel %vm415_vm7, %v417_v22, %v422_v32 }
  0xb2   :  { %551 = vmatprep.mubr.f32.mxu0 %v445_v56  ;;  %vm381_vm12 = vcmp.eq.s32.totalorder %v1081_v12, %v371_v61  ;;  %vm382_vm14 = vcmp.eq.s32.totalorder %v1084_v5, %v371_v61  ;;  %v257_v4 = vadd.f32 %v239_v50, %v1233_v40  ;;  %v334_v49 = vsel %vm320_vm13, %v329_v6, %v333_v60  ;;  %v641_v50 = vld [vmem:[%s1364_s1 + $0x108] sm:$0xff] }
  0xb3   :  { %v444_v52 = vadd.f32 %v423_v37, %v349_v36  ;;  %v784_v7 = vsel %vm381_vm12, 1.0, %v929_v15  ;;  %v785_v19 = vsel %vm382_vm14, 1.0, %v929_v15  ;;  %v243_v20 = vsel %vm225_vm8, %v238_v17, %v242_v38 }
  0xb4   :  { %v426_v22 = vrot.slane %v784_v7, 4  ;;  %v428_v8 = vrot.slane %v785_v19, 4  ;;  %v352_v12 = vadd.f32 %v334_v49, %v257_v4  ;;  %v259_v10 = vadd.f32 %v243_v20, %v164_v31 }
  0xb5   :  { %552 = vmatmul.mubr.f32.gmra.mrb[2].mxu0 %v444_v52  ;;  %v338_v5 = vsel %vm320_vm13, %v333_v60, %v337_v46  ;;  %v256_v40 = vadd.f32 %v1259_v26, %v1223_v51  ;;  %v332_v41 = vsel %vm320_vm13, %v327_v3, %v331_v59  ;;  %v258_v6 = vadd.f32 %v241_v44, %v163_v30  ;;  %v640_v26 = vld [vmem:[%s1364_s1 + $0x100] sm:$0xff] }
  0xb6   :  { %v429_v13 = vsel %vm415_vm7, %v424_v0, %v428_v8  ;;  %v354_v9 = vadd.f32 %v338_v5, %v259_v10  ;;  %v433_v14 = vsel %vm415_vm7, %v428_v8, %v432_v23  ;;  %v427_v17 = vsel %vm415_vm7, %v422_v32, %v426_v22  ;;  %v571_v32 = vld [vmem:[%s1364_s1 + $0x118] sm:$0xff]  ;;  %s932_s1 = smov [#allocation2]  }
  0xb7   :  { %v447_v18 = vadd.f32 %v429_v13, %v352_v12  ;;  %v351_v25 = vadd.f32 %v332_v41, %v256_v40  ;;  %v336_v27 = vsel %vm320_vm13, %v331_v59, %v335_v45  ;;  %v431_v28 = vsel %vm415_vm7, %v426_v22, %v430_v24  ;;  %s731_s6 = sshll.u32 %s932_s1, 4  ;;  %s732_s6 = int_to_ptr.vmem [resolvable:$true] %s731_s6 }
  0xb8   :  { %v449_v29 = vadd.f32 %v433_v14, %v354_v9  ;;  %v353_v51 = vadd.f32 %v336_v27, %v258_v6  ;;  %v930_v53 = vmov 0.0|0.0   ;;  %v879_v30 = vpack.c.bf16 %v641_v50, %v640_v26  ;;  %s904_s7 = scalar_lea.vmem %s732_s6, 32  ;;  %p909_p1 = scmp.lt.s32.totalorder %s732_s6, %s732_s6 }
  0xb9   :  { %556 = vmatprep.mubr.f32.mxu0 %v447_v18  ;;  %v446_v54 = vadd.f32 %v427_v17, %v351_v25  ;;  %878 = vmatprep.subr.bf16.mxu1 %v930_v53  ;;  %vm931_vm8 = vmmov 0   ;;  %v573_v63 = vshrl.u32 %v17_v11, 7  ;;  %vm621_vm15 = vcmask 195584   ;;  %p905_p0 = scmp.ne.s32.totalorder %s732_s6, %s904_s7  ;;  %p910_p2 = scmp.lt.s32.totalorder %s904_s7, %s904_s7 }
  0xba   :  { %561 = vmatprep.mubr.f32.mxu1 %v449_v29  ;;  %v448_v3 = vadd.f32 %v431_v28, %v353_v51  ;;  %vm649_vm1 = vcmask 1041409   ;;  %vm723_vm2 = vcmask 25600  }
  0xbb   :  { %557 = vmatmul.mubr.f32.gmra.mrb[4].mxu0 %v446_v54  ;;  %v645_v31 = vsub.s32 1, %v573_v63  ;;  %v574_v34 = vadd.s32 8, %v573_v63  ;;  %v581_v11 = vand.u32 15, %v573_v63  ;;  %v611_v35 = vsub.s32 0, %v573_v63  ;;  %p911_p3 = por %p910_p2, %p909_p1 }
  0xbc   :  { %562 = vmatmul.mubr.f32.vlgmr.msra.gmra.mrb[0].mxu1 %v448_v3  ;;  %v575_v43 = vadd.s32 16, %v573_v63  ;;  %v576_v44 = vadd.s32 24, %v573_v63 }
  0xbd   :  { %843 = vmatprep.mubr.msk.f32.mxu1 %vm931_vm8, %v929_v15  ;;  %880 = vmatpush3.bf16.msra.mxu1 %v879_v30  ;;  %v1343_v0 = vrot.slane %v571_v32, %v645_v31  ;;  %v588_v38 = vand.u32 15, %v574_v34  ;;  %v612_v42 = vrot.slane %v571_v32, %v611_v35  ;;  %p912_p4 = pnand %p911_p3, %p905_p0 }
  0xbe   :  { %841 = vmatprep.subr.mxu1 %v929_v15  ;;  %v605_v15 = vcvt.s32.f32 %v581_v11  ;;  %v595_v55 = vand.u32 15, %v575_v43  ;;  %v602_v58 = vand.u32 15, %v576_v44 }
  0xbf   :  { %v606_v45 = vcvt.s32.f32 %v588_v38 }
  0xc0   :  { %vm613_vm13 = vcmp.le.f32.partialorder %v605_v15, %v612_v42  ;;  %v607_v61 = vcvt.s32.f32 %v595_v55  ;;  %v608_v56 = vcvt.s32.f32 %v602_v58 }
  0xc1   :  { %842 = vmatpush3.msra.mxu1 %v642_v1  ;;  %vm614_vm7 = vcmp.le.f32.partialorder %v606_v45, %v612_v42 }
  0xc2   :  { %vm615_vm5 = vcmp.le.f32.partialorder %v607_v61, %v612_v42  ;;  %vm616_vm0 = vcmp.le.f32.partialorder %v608_v56, %v612_v42 }
 0x179   :  { %v821_v2 = vpop.f32.mrb[0].mxu0 }
 0x17a   :  { %v822_v33 = vpop.f32.mrb[1].mxu0 }
 0x17b   :  { %v823_v16 = vadd.f32 %v822_v33, %v821_v2 }
 0x17d   :  { %v567_v46 = vmax.f32 %v823_v16, 0.0 }
 0x17f   :  { %v617_v59 = vsel %vm613_vm13, %v567_v46, 0.0 }
 0x180   :  { %v622_v21 = vsel %vm621_vm15, %v617_v59, -inf }
 0x188   :  { %v824_v47 = vpop.f32.mrb[2].mxu0 }
 0x189   :  { %v825_v48 = vpop.f32.mrb[3].mxu0 }
 0x18a   :  { %v826_v57 = vadd.f32 %v825_v48, %v824_v47 }
 0x18c   :  { %v568_v60 = vmax.f32 %v826_v57, 0.0 }
 0x18e   :  { %v618_v39 = vsel %vm614_vm7, %v568_v60, 0.0  ;;  %v827_v62 = vpop.f32.mrb[4].mxu0 }
 0x18f   :  { %v623_v24 = vsel %vm621_vm15, %v618_v39, -inf  ;;  %v830_v23 = vpop.f32.mrb[0].mxu1  ;;  %v828_v36 = vpop.f32.mrb[5].mxu0 }
 0x190   :  { %v624_v37 = vmax.f32 %v622_v21, %v623_v24  ;;  %v829_v4 = vadd.f32 %v828_v36, %v827_v62  ;;  %v831_v49 = vpop.f32.mrb[1].mxu1 }
 0x191   :  { %v832_v52 = vadd.f32 %v831_v49, %v830_v23 }
 0x192   :  { %v625_v7 = vrot.slane %v624_v37, 4  ;;  %v569_v19 = vmax.f32 %v829_v4, 0.0 }
 0x193   :  { %v570_v20 = vmax.f32 %v832_v52, 0.0 }
 0x194   :  { %v626_v22 = vmax.f32 %v624_v37, %v625_v7  ;;  %v619_v8 = vsel %vm615_vm5, %v569_v19, 0.0 }
 0x195   :  { %v631_v12 = vsel %vm621_vm15, %v619_v8, -inf  ;;  %v620_v10 = vsel %vm616_vm0, %v570_v20, 0.0 }
 0x196   :  { %v632_v5 = vsel %vm621_vm15, %v620_v10, -inf  ;;  %v627_v40 = vrot.slane %v626_v22, 2 }
 0x197   :  { %v633_v41 = vmax.f32 %v631_v12, %v632_v5 }
 0x198   :  { %v628_v13 = vmax.f32 %v626_v22, %v627_v40 }
 0x199   :  { %v634_v6 = vrot.slane %v633_v41, 4 }
 0x19a   :  { %v629_v17 = vrot.slane %v628_v13, 1 }
 0x19b   :  { %v635_v9 = vmax.f32 %v633_v41, %v634_v6 }
 0x19c   :  { %v630_v27 = vmax.f32 %v628_v13, %v629_v17 }
 0x19d   :  { %v636_v14 = vrot.slane %v635_v9, 2 }
 0x19f   :  { %v637_v18 = vmax.f32 %v635_v9, %v636_v14 }
 0x1a1   :  { %v638_v25 = vrot.slane %v637_v18, 1 }
 0x1a3   :  { %v639_v28 = vmax.f32 %v637_v18, %v638_v25 }
 0x1a5   :  { %v650_v29 = vsel %vm649_vm1, %v639_v28, %v630_v27 }
 0x1a6   :  { %844 = vmatmul.mubr.msk.f32.vlgmr.msra.gmra.mrb[2].mxu1 %vm621_vm15, %v650_v29 }
 0x279   :  { %v719_v51 = vpop.f32.mrb[2].mxu1 }
 0x27a   :  { %v720_v54 = vadd.f32 %v719_v51, %v1343_v0  ;;  %v845_v3 = vpop.f32.mrb[3].mxu1 }
 0x27c   :  { %724 = vst.msk [vmem:[#allocation2] sm:$0x3] %vm723_vm2, %v720_v54 }
 0x27d   :  { %915 = shalt.err (!%p912_p4)
}
 0x27e   :  { %s916_s10 = scalar_lea.hbm %s1365_s2, 32 }
 0x27f   :  { %p917_p5 = scmp.ne.s32.totalorder %s1365_s2, %s916_s10  ;;  %p920_p6 = scmp.lt.u32.totalorder %s916_s10, %s1365_s2 }
 0x281   :  { %p922_p7 = pnand %p920_p6, %p917_p5 }
 0x283   :  { %925 = shalt.err (!%p922_p7)
}
 0x284   :  { %734 = dma.vmem_to_hbm [thread:$0]  %s732_s6, 32, %s1365_s2, [#allocation3]  }
 0x285   :  { %926 = dma.done.wait [#allocation3], 32  }
 0x286   :  { %927 = vsyncadd [#allocation3], 4294967264 }
 0x287   :  { %738 = vsyncpa [#allocation3], 1 }

</bundles_post_ra>
